<compile_context>
chip_gen: v5e
topology: v5e:2x2
jax: 0.10.0
libtpu: 0.0.40
codegen_flags: <defaults>
</compile_context>

<pallas_src>
import functools

import jax
import jax.numpy as jnp
import numpy as np
from jax.experimental import pallas as pl
from jax.experimental.pallas import tpu as pltpu


def cann_kernel(z_ref, wqkv_ref, bqkv_ref, out_ref, *, latent_dim):
    """One grid step == one (asset_dim, latent_dim) problem."""
    z = z_ref[0]                                                         # (A, L)

    # --- single fused QKV projection: one MXU matmul with N = 3L ---
    qkv = jnp.dot(z, wqkv_ref[...],
                  preferred_element_type=jnp.float32) + bqkv_ref[...]    # (A, 3L)

    L = latent_dim
    q = qkv[:, 0 * L:1 * L]       # 1/sqrt(L) already folded into wq/bq host-side
    k = qkv[:, 1 * L:2 * L]
    v = qkv[:, 2 * L:3 * L]

    # --- single-head attention over the asset dim ---
    # Contract on the lane dim: no explicit k transpose relayout.
    scores = jnp.einsum("ad,ed->ae", q, k,
                        preferred_element_type=jnp.float32)              # (A, A)
    scores = scores - jnp.max(scores, axis=-1, keepdims=True)
    p = jnp.exp(scores)
    # Denominator via EUP reciprocal (separate VLIW slot).
    inv = pl.reciprocal(jnp.sum(p, axis=-1, keepdims=True), approx=True)
    p = p * inv

    h = jnp.dot(p, v, preferred_element_type=jnp.float32)                # (A, L)
    out_ref[0] = h.astype(out_ref.dtype)


def cann_forward(z, params):
    """CANN forward. z: (A, L) or (B, A, L) -> same shape."""
    squeeze = (z.ndim == 2)
    if squeeze:
        z = z[None]
    B, A, L = z.shape
    scale = float(L) ** (-0.5)

    # One-time host-side weight transform: fold the attention scale into the
    # q projection and fuse wq|wk|wv (and biases) into a single operand each.
    w_qkv = jnp.concatenate(
        [params["wq"] * scale, params["wk"], params["wv"]], axis=1)      # (L, 3L)
    b_qkv = jnp.concatenate(
        [params["bq"] * scale, params["bk"], params["bv"]], axis=1)      # (1, 3L)

    kernel = functools.partial(cann_kernel, latent_dim=L)

    out = pl.pallas_call(
        kernel,
        out_shape=jax.ShapeDtypeStruct((B, A, L), z.dtype),
        grid_spec=pltpu.PrefetchScalarGridSpec(
            num_scalar_prefetch=0,
            grid=(B,),                                   # one problem per step
            in_specs=[
                pl.BlockSpec((1, A, L), lambda b: (b, 0, 0)),
                pl.BlockSpec((L, 3 * L), lambda b: (0, 0)),   # VMEM-resident
                pl.BlockSpec((1, 3 * L), lambda b: (0, 0)),   # VMEM-resident
            ],
            out_specs=pl.BlockSpec((1, A, L), lambda b: (b, 0, 0)),
        ),
        compiler_params=pltpu.CompilerParams(
            dimension_semantics=("parallel",),           # dual-TC sharding on v7x
        ),
    )(z, w_qkv, b_qkv)

    return out[0] if squeeze else out


def reference_cann(z, params):
    """Pure-JAX reference mirroring the PyTorch CANN.forward (single problem)."""
    L = z.shape[-1]
    scale = float(L) ** (-0.5)
    q = z @ params["wq"] + params["bq"]
    k = z @ params["wk"] + params["bk"]
    v = z @ params["wv"] + params["bv"]
    scores = (q @ k.T) * scale
    attn = jax.nn.softmax(scores, axis=-1)
    return attn @ v


def make_params(key, latent_dim):
    ks = jax.random.split(key, 6)
    sc = 0.1
    return {
        # weights stored (in_dim, out_dim) == PyTorch nn.Linear weight transposed
        "wq": jax.random.normal(ks[0], (latent_dim, latent_dim), jnp.float32) * sc,
        "bq": jax.random.normal(ks[1], (1, latent_dim), jnp.float32) * sc,
        "wk": jax.random.normal(ks[2], (latent_dim, latent_dim), jnp.float32) * sc,
        "bk": jax.random.normal(ks[3], (1, latent_dim), jnp.float32) * sc,
        "wv": jax.random.normal(ks[4], (latent_dim, latent_dim), jnp.float32) * sc,
        "bv": jax.random.normal(ks[5], (1, latent_dim), jnp.float32) * sc,
    }


if __name__ == "__main__":
    # Small shapes consistent with the module: (asset_dim, latent_dim)
    A, L, B = 16, 32, 4

    key = jax.random.PRNGKey(0)
    kz, kzb, kp = jax.random.split(key, 3)
    params = make_params(kp, L)

    # 1) Single-problem path, matching the PyTorch module signature exactly.
    z = jax.random.normal(kz, (A, L), jnp.float32)
    out = jax.block_until_ready(cann_forward(z, params))
    ref = reference_cann(z, params)
    np.testing.assert_allclose(np.asarray(out), np.asarray(ref),
                               atol=2e-3, rtol=2e-3)

    # 2) Batched path: B independent problems in one pallas_call.
    zb = jax.random.normal(kzb, (B, A, L), jnp.float32)
    out_b = jax.block_until_ready(cann_forward(zb, params))
    ref_b = jax.vmap(lambda x: reference_cann(x, params))(zb)
    np.testing.assert_allclose(np.asarray(out_b), np.asarray(ref_b),
                               atol=2e-3, rtol=2e-3)

    print("KERNEL_OK")
</pallas_src>

<mosaic_0001>
module attributes {stable_mosaic.version = 11 : i64} {
  func.func @cann_kernel(%arg0: i32, %arg1: memref<1x16x32xf32, #tpu.memory_space<vmem>>, %arg2: memref<32x96xf32, #tpu.memory_space<vmem>>, %arg3: memref<1x96xf32, #tpu.memory_space<vmem>>, %arg4: memref<1x16x32xf32, #tpu.memory_space<vmem>>) attributes {dimension_semantics = [#tpu.dimension_semantics<parallel>], iteration_bounds = array<i64: 1>, scalar_prefetch = 0 : i64, scratch_operands = 0 : i64, tpu.core_type = #tpu.core_type<tc>, window_params = [{transform_indices = @transform_0, window_bounds = array<i64: 1, 16, 32>}, {pipeline_mode = #tpu.pipeline_mode<synchronous>, transform_indices = @transform_1, window_bounds = array<i64: 32, 96>}, {pipeline_mode = #tpu.pipeline_mode<synchronous>, transform_indices = @transform_2, window_bounds = array<i64: 1, 96>}, {transform_indices = @transform_3, window_bounds = array<i64: 1, 16, 32>}]} {
    %c0 = arith.constant 0 : index
    %c0_0 = arith.constant 0 : index
    %c0_1 = arith.constant 0 : index
    %0 = vector.load %arg1[%c0, %c0_0, %c0_1] : memref<1x16x32xf32, #tpu.memory_space<vmem>>, vector<1x16x32xf32>
    %1 = vector.shape_cast %0 : vector<1x16x32xf32> to vector<16x32xf32>
    %c0_2 = arith.constant 0 : index
    %c0_3 = arith.constant 0 : index
    %2 = vector.load %arg2[%c0_2, %c0_3] : memref<32x96xf32, #tpu.memory_space<vmem>>, vector<32x96xf32>
    %cst = arith.constant dense<0.000000e+00> : vector<16x96xf32>
    %3 = tpu.matmul %1, %2, %cst {dimension_numbers = #tpu.dot_dimension_numbers<[1], [0], [0], [1], [0, 0, 1, 1], [], []>} : vector<16x32xf32>, vector<32x96xf32>, vector<16x96xf32> -> vector<16x96xf32>
    %c0_4 = arith.constant 0 : index
    %c0_5 = arith.constant 0 : index
    %4 = vector.load %arg3[%c0_4, %c0_5] : memref<1x96xf32, #tpu.memory_space<vmem>>, vector<1x96xf32>
    %5 = vector.broadcast %4 : vector<1x96xf32> to vector<16x96xf32>
    %6 = arith.addf %3, %5 : vector<16x96xf32>
    %7 = vector.extract_strided_slice %6 {offsets = [0, 0], sizes = [16, 32], strides = [1, 1]} : vector<16x96xf32> to vector<16x32xf32>
    %8 = vector.extract_strided_slice %6 {offsets = [0, 32], sizes = [16, 32], strides = [1, 1]} : vector<16x96xf32> to vector<16x32xf32>
    %9 = vector.extract_strided_slice %6 {offsets = [0, 64], sizes = [16, 32], strides = [1, 1]} : vector<16x96xf32> to vector<16x32xf32>
    "tpu.trace_start"() <{level = 10 : i32, message = "ad,ed->ae"}> : () -> ()
    %cst_6 = arith.constant dense<0.000000e+00> : vector<16x16xf32>
    %10 = tpu.matmul %7, %8, %cst_6 {dimension_numbers = #tpu.dot_dimension_numbers<[1], [1], [0], [0], [0, 0, 1, 0], [], []>} : vector<16x32xf32>, vector<16x32xf32>, vector<16x16xf32> -> vector<16x16xf32>
    "tpu.trace_stop"() : () -> ()
    %cst_7 = arith.constant dense<0xFF800000> : vector<16xf32>
    %11 = vector.multi_reduction <maximumf>, %10, %cst_7 [1] : vector<16x16xf32> to vector<16xf32>
    %12 = vector.shape_cast %11 : vector<16xf32> to vector<16x1xf32>
    %13 = vector.broadcast %12 : vector<16x1xf32> to vector<16x16xf32>
    %14 = arith.subf %10, %13 : vector<16x16xf32>
    %15 = math.exp %14 : vector<16x16xf32>
    %cst_8 = arith.constant dense<0.000000e+00> : vector<16xf32>
    %16 = vector.multi_reduction <add>, %15, %cst_8 [1] : vector<16x16xf32> to vector<16xf32>
    %17 = vector.shape_cast %16 : vector<16xf32> to vector<16x1xf32>
    %18 = tpu.reciprocal %17 {approx = true} : vector<16x1xf32> -> vector<16x1xf32>
    %19 = vector.broadcast %18 : vector<16x1xf32> to vector<16x16xf32>
    %20 = arith.mulf %15, %19 : vector<16x16xf32>
    %cst_9 = arith.constant dense<0.000000e+00> : vector<16x32xf32>
    %21 = tpu.matmul %20, %9, %cst_9 {dimension_numbers = #tpu.dot_dimension_numbers<[1], [0], [0], [1], [0, 0, 1, 1], [], []>} : vector<16x16xf32>, vector<16x32xf32>, vector<16x32xf32> -> vector<16x32xf32>
    %c0_10 = arith.constant 0 : index
    %c0_11 = arith.constant 0 : index
    %c0_12 = arith.constant 0 : index
    %22 = vector.load %arg4[%c0_10, %c0_11, %c0_12] : memref<1x16x32xf32, #tpu.memory_space<vmem>>, vector<1x16x32xf32>
    %23 = vector.shape_cast %22 : vector<1x16x32xf32> to vector<16x32xf32>
    %24 = vector.shape_cast %21 : vector<16x32xf32> to vector<1x16x32xf32>
    tpu.vector_store %arg4[%c0_10, %c0_11, %c0_12], %24 {strides = array<i32>} : memref<1x16x32xf32, #tpu.memory_space<vmem>>, vector<1x16x32xf32>,
    return
  }
  func.func @transform_0(%arg0: i32) -> (i32, i32, i32) {
    %c0_i32 = arith.constant 0 : i32
    %c0_i32_0 = arith.constant 0 : i32
    %c0_i32_1 = arith.constant 0 : i32
    return %arg0, %c0_i32, %c0_i32_0 : i32, i32, i32
  }
  func.func @transform_1(%arg0: i32) -> (i32, i32) {
    %c0_i32 = arith.constant 0 : i32
    %c0_i32_0 = arith.constant 0 : i32
    %c0_i32_1 = arith.constant 0 : i32
    return %c0_i32, %c0_i32_0 : i32, i32
  }
  func.func @transform_2(%arg0: i32) -> (i32, i32) {
    %c0_i32 = arith.constant 0 : i32
    %c0_i32_0 = arith.constant 0 : i32
    %c0_i32_1 = arith.constant 0 : i32
    return %c0_i32, %c0_i32_0 : i32, i32
  }
  func.func @transform_3(%arg0: i32) -> (i32, i32, i32) {
    %c0_i32 = arith.constant 0 : i32
    %c0_i32_0 = arith.constant 0 : i32
    %c0_i32_1 = arith.constant 0 : i32
    return %arg0, %c0_i32, %c0_i32_0 : i32, i32, i32
  }
}

</mosaic_0001>

<bundles_post_ra>
// kernel: tpu_custom_call.1
= control target key start
LH: loop header
LB: loop body
LE: loop exit
PB: predicated region body
PF: predicated region fallthrough
CT: control target
= control target key end

     0   :  { %8 = vsyncpa [#allocation3], 0  ;;  %s377_s0 = inlined_call_operand.hbm [shape: f32[1,16,32], index: 0, kind: input, shape index: {}]   ;;  %s378_s1 = inlined_call_operand.hbm [shape: f32[32,96], index: 1, kind: input, shape index: {}]   ;;  %s379_s2 = inlined_call_operand.vmem [shape: f32[1,96], index: 2, kind: input, shape index: {}]   ;;  %s380_s3 = inlined_call_operand.hbm [shape: f32[1,16,32], index: 3, kind: output, shape index: {}]  }
   0x1   :  { %9 = vsyncpa [#allocation6], 0 }
   0x2   :  { %10 = vsyncpa [#allocation4], 0  ;;  %s15_s14 = sshll.u32 %s377_s0, 4  ;;  %s315_s15 = smov [#allocation2]   ;;  %s16_s14 = int_to_ptr.hbm [resolvable:$true] %s15_s14 }
   0x3   :  { %s17_s16 = sshll.u32 %s315_s15, 4  ;;  %s28_s19 = sshll.u32 %s378_s1, 4  ;;  %s18_s16 = int_to_ptr.vmem [resolvable:$true] %s17_s16  ;;  %s29_s19 = int_to_ptr.hbm [resolvable:$true] %s28_s19 }
   0x4   :  { %s316_s20 = smov 128   ;;  %s317_s21 = smov 8  }
   0x5   :  { %23 = dma.hbm_to_vmem [thread:$0]  %s16_s14, 256, %s18_s16, [#allocation3], %s316_s20, %s316_s20, %s317_s21  }
   0x6   :  { %s318_s22 = smov [#allocation5]  }
   0x7   :  { %s30_s23 = sshll.u32 %s318_s22, 4  ;;  %s31_s23 = int_to_ptr.vmem [resolvable:$true] %s30_s23 }
   0x8   :  { %36 = dma.hbm_to_vmem [thread:$0]  %s29_s19, 512, %s31_s23, [#allocation6], %s316_s20, %s316_s20, %s317_s21  }
   0x9   :  { %309 = dma.done.wait [#allocation3], 256  }
   0xa   :  { %310 = vsyncadd [#allocation3], 4294967040 }
   0xb   :  { %311 = dma.done.wait [#allocation6], 512  }
   0xc   :  { %312 = vsyncadd [#allocation6], 4294966784  ;;  %v52_v0 = vld [vmem:[#allocation5 + $0x18] sm:$0xff]  ;;  %v51_v1 = vld [vmem:[#allocation5 + $0x10] sm:$0xff]  ;;  %vm57_vm0 = vcmask 261120   ;;  %s319_s24 = smov 96  }
   0xd   :  { %212 = vmatpush.msra.mxu3 %v52_v0  ;;  %76 = vmatpush.msra.mxu0 %v52_v0  ;;  %v50_v2 = vld [vmem:[#allocation5 + $0x8] sm:$0xff]  ;;  %v49_v3 = vld [vmem:[#allocation5] sm:$0xff]  ;;  %v48_v4 = vld [vmem:[#allocation2 + $0x8] sm:$0xff]  ;;  %vm124_vm1 = vcmask 130048   ;;  %s321_s25 = smov [#allocation7]   ;;  %s190_s29 = sshll.u32 %s380_s3, 4  ;;  %s191_s29 = int_to_ptr.hbm [resolvable:$true] %s190_s29 }
   0xe   :  { %v47_v5 = vld [vmem:[#allocation2] sm:$0xff]  ;;  %s188_s26 = sshll.u32 %s321_s25, 4  ;;  %s189_s26 = int_to_ptr.vmem [resolvable:$true] %s188_s26 }
   0xf   :  { %213 = vmatpush.msra.mxu3 %v51_v1  ;;  %77 = vmatpush.msra.mxu0 %v51_v1  ;;  %v228_v6 = vld [vmem:[%s379_s2] ss:$0 sm:$0xff]  ;;  %s320_s2 = smov 64  }
  0x11   :  { %214 = vmatpush.msra.mxu3 %v50_v2  ;;  %78 = vmatpush.msra.mxu0 %v50_v2 }
  0x13   :  { %215 = vmatpush.msra.mxu3 %v49_v3  ;;  %79 = vmatpush.msra.mxu0 %v49_v3 }
  0x14   :  { %205 = vmatmul.msk.f32.vlgmr.msra.gmra.mxu3 %vm57_vm0, %v48_v4  ;;  %204 = vmatmul.msk.f32.vlgmr.msra.gmra.mxu0 %vm57_vm0, %v47_v5 }
  0x91   :  { %v81_v9 = vpop.f32.mrf.mxu0 }
  0x92   :  { %v82_v10 = vadd.f32 %v228_v6, %v81_v9 }
  0x97   :  { %v84_v7 = vpop.f32.mrf.mxu3 }
  0x98   :  { %v85_v8 = vadd.f32 %v228_v6, %v84_v7 }
  0x9a   :  { %91 = vrot.lane.b32.xlu0 %v85_v8, %s319_s24  ;;  %v223_v27 = vpack.i.bf16 %v82_v10, %v85_v8 }
  0xa2   :  { %89 = vrot.lane.b32.xlu0 %v82_v10, %s319_s24 }
 0x10c   :  { %v92_v11 = vpop.permute.xlu0 %91 }
 0x10d   :  { %206 = vmatpush.xpose.msk.msra.mxu1 %vm57_vm0, %v92_v11 }
 0x114   :  { %v90_v12 = vpop.permute.xlu0 %89 }
 0x115   :  { %207 = vmatpush.xpose.msk.msra.mxu1 %vm57_vm0, %v90_v12 }
 0x118   :  { %208 = vmatmul.msk.f32.vlgmr.msra.gmra.mxu1 %vm57_vm0, %v82_v10 }
 0x120   :  { %209 = vmatmul.msk.f32.gmra.mxu1 %vm57_vm0, %v85_v8 }
 0x195   :  { %v118_v13 = vpop.f32.mrf.mxu1 }
 0x196   :  { %v125_v14 = vsel %vm124_vm1, %v118_v13, -inf }
 0x197   :  { %126 = vmax.xlane.f32.xlu1 %v125_v14 }
 0x19d   :  { %v121_v15 = vpop.f32.mrf.mxu1 }
 0x19e   :  { %v128_v16 = vsel %vm124_vm1, %v121_v15, -inf }
 0x19f   :  { %129 = vmax.xlane.f32.xlu1 %v128_v16 }
 0x20a   :  { %v127_v17 = vpop.xlane.xlu1 %126 }
 0x20b   :  { %v131_v18 = vsub.f32 %v118_v13, %v127_v17 }
 0x20d   :  { %v133_v19 = vmul.f32 1.442695, %v131_v18 }
 0x20f   :  { %229 = vpow2.f32 %v133_v19 }
 0x212   :  { %v130_v20 = vpop.xlane.xlu1 %129 }
 0x213   :  { %v132_v21 = vsub.f32 %v121_v15, %v130_v20 }
 0x215   :  { %v230_v22 = vpop.eup %229  ;;  %v135_v23 = vmul.f32 1.442695, %v132_v21 }
 0x216   :  { %v137_v24 = vsel %vm124_vm1, %v230_v22, 0.0 }
 0x217   :  { %231 = vpow2.f32 %v135_v23  ;;  %138 = vadd.xlane.f32.xlu2 %v137_v24 }
 0x21d   :  { %v232_v25 = vpop.eup %231 }
 0x21e   :  { %v140_v26 = vsel %vm124_vm1, %v232_v25, 0.0 }
 0x21f   :  { %141 = vadd.xlane.f32.xlu0 %v140_v26 }
 0x22f   :  { %224 = vrot.lane.b32.xlu2 %v223_v27, %s320_s2 }
 0x28a   :  { %v139_v28 = vpop.xlane.xlu2 %138 }
 0x28b   :  { %233 = vrcp.f32 %v139_v28 }
 0x291   :  { %v234_v31 = vpop.eup %233 }
 0x292   :  { %v225_v29 = vpop.permute.xlu2 %224  ;;  %v142_v30 = vpop.xlane.xlu0 %141  ;;  %v145_v34 = vmul.f32 %v234_v31, %v230_v22 }
 0x293   :  { %v226_v32 = vunpack.i.l.bf16 %v225_v29  ;;  %v227_v33 = vunpack.i.h.bf16 %v225_v29  ;;  %235 = vrcp.f32 %v142_v30 }
 0x295   :  { %173 = vmatpush.msra.mxu2 %v226_v32 }
 0x297   :  { %174 = vmatpush.msra.mxu2 %v227_v33 }
 0x298   :  { %210 = vmatmul.msk.f32.vlgmr.msra.gmra.mxu2 %vm124_vm1, %v145_v34 }
 0x299   :  { %v236_v35 = vpop.eup %235 }
 0x29a   :  { %v146_v36 = vmul.f32 %v236_v35, %v232_v25 }
 0x2a0   :  { %211 = vmatmul.msk.f32.gmra.mxu2 %vm124_vm1, %v146_v36 }
 0x31b   :  { %v176_v37 = vpop.f32.mrf.mxu2 }
 0x31c   :  { %182 = vst.msk [vmem:[#allocation7] sm:$0xff] %vm57_vm0, %v176_v37 }
 0x323   :  { %v179_v38 = vpop.f32.mrf.mxu2 }
 0x324   :  { %183 = vst.msk [vmem:[#allocation7 + $0x8] sm:$0xff] %vm57_vm0, %v179_v38 }
 0x325   :  { %196 = dma.vmem_to_hbm [thread:$0]  %s189_s26, 256, %s191_s29, [#allocation4], %s316_s20, %s316_s20, %s317_s21  }
 0x326   :  { %313 = dma.done.wait [#allocation4], 256  }
 0x327   :  { %314 = vsyncadd [#allocation4], 4294967040 }
 0x328   :  { %201 = vsyncpa [#allocation3], 1 }
 0x329   :  { %202 = vsyncpa [#allocation6], 1 }
 0x32a   :  { %203 = vsyncpa [#allocation4], 1 }

</bundles_post_ra>
